<compile_context>
chip_gen: v7x
topology: tpu7x:2x2x1
jax: 0.10.0
libtpu: 0.0.40
codegen_flags: <defaults>
</compile_context>

<pallas_src>
import math

import jax
import jax.numpy as jnp
from jax.experimental import pallas as pl
from jax.experimental.pallas import tpu as pltpu


def _round_up(x, m):
    return ((x + m - 1) // m) * m


# ----------------------------------------------------------------------------
# Kernel factory: the (static) tree wiring is baked in, so every slice below
# is static.
# ----------------------------------------------------------------------------
def make_tree_nn_kernel(levels, compute_dtype):
    """levels: list of (base_row, [(left_row, right_row), ...padded_to_x8])."""

    def kernel(leaf_ref, wcat_ref, bt_ref, wc_ref, bc_ref, out_ref,
               buf_ref, cat_ref):
        num_leaves = leaf_ref.shape[0]
        e_pad = leaf_ref.shape[1]

        # Leaf representations occupy rows [0, num_leaves) of the node buffer.
        buf_ref[pl.ds(0, num_leaves), :] = leaf_ref[...]

        bt = bt_ref[...]                                    # (1, e_pad), f32
        h = None
        for base, pairs in levels:                          # static unroll
            p = len(pairs)
            # Gather children into a lane-dense (p, 2*e_pad) concat block.
            # All offsets static -> plain full-lane vld/vst pairs, independent
            # across t, freely schedulable off the MXU critical path.
            for t, (li, ri) in enumerate(pairs):
                cat_ref[pl.ds(t, 1), pl.ds(0, e_pad)] = buf_ref[pl.ds(li, 1), :]
                cat_ref[pl.ds(t, 1), pl.ds(e_pad, e_pad)] = buf_ref[pl.ds(ri, 1), :]
            cat = cat_ref[pl.ds(0, p), :].astype(compute_dtype)
            # One fused MXU matmul for the whole level:
            #   [l | r] @ [W_l ; W_r]  ==  cat(l, r) @ W_tree.T
            z = jnp.dot(cat, wcat_ref[...],
                        preferred_element_type=jnp.float32) + bt
            h = jnp.tanh(z)                                 # (p, e_pad), f32
            buf_ref[pl.ds(base, p), :] = h

        # Root = slot 0 of the deepest level (the unique max-depth node), or
        # the single leaf if the tree has no internal nodes.
        if h is None:
            root = buf_ref[pl.ds(0, 1), :]
        else:
            root = h[0:1, :]
        out_ref[...] = (jnp.dot(root, wc_ref[...],
                                preferred_element_type=jnp.float32)
                        + bc_ref[...])

    return kernel


def tree_nn_forward(leaf_emb, levels_struct, w_tree, b_tree, w_cls, b_cls,
                    compute_dtype=jnp.float32):
    """leaf_emb: [num_leaves, E]; w_tree: [E, 2E] (torch layout); w_cls: [O, E]."""
    num_leaves, embed_dim = leaf_emb.shape
    output_dim = w_cls.shape[0]
    e_pad = max(128, _round_up(embed_dim, 128))
    o_pad = max(128, _round_up(output_dim, 128))

    levels, total_rows, p_max = levels_struct

    # Split + transpose the tree-layer weight so the in-kernel lane-concat of
    # (left | right) multiplies a single stacked RHS:
    #   cat(l, r) @ W.T == [l | r] @ [ W[:, :E].T ; W[:, E:].T ]
    wl = jnp.asarray(w_tree[:, :embed_dim].T, jnp.float32)      # (E, E)
    wr = jnp.asarray(w_tree[:, embed_dim:].T, jnp.float32)      # (E, E)
    wcat = jnp.zeros((2 * e_pad, e_pad), jnp.float32)
    wcat = wcat.at[:embed_dim, :embed_dim].set(wl)
    wcat = wcat.at[e_pad:e_pad + embed_dim, :embed_dim].set(wr)
    wcat = wcat.astype(compute_dtype)

    bt = jnp.zeros((1, e_pad), jnp.float32).at[0, :embed_dim].set(
        jnp.asarray(b_tree, jnp.float32))
    wc = jnp.zeros((e_pad, o_pad), jnp.float32).at[:embed_dim, :output_dim].set(
        jnp.asarray(w_cls.T, jnp.float32))
    bc = jnp.zeros((1, o_pad), jnp.float32).at[0, :output_dim].set(
        jnp.asarray(b_cls, jnp.float32))
    leaf_pad = jnp.zeros((num_leaves, e_pad), jnp.float32).at[:, :embed_dim].set(
        jnp.asarray(leaf_emb, jnp.float32))

    kernel = make_tree_nn_kernel(levels, compute_dtype)

    out = pl.pallas_call(
        kernel,
        out_shape=jax.ShapeDtypeStruct((1, o_pad), jnp.float32),
        in_specs=[pl.BlockSpec(memory_space=pltpu.MemorySpace.VMEM)] * 5,
        out_specs=pl.BlockSpec(memory_space=pltpu.MemorySpace.VMEM),
        scratch_shapes=[
            pltpu.VMEM((total_rows, e_pad), jnp.float32),    # node reps (f32)
            pltpu.VMEM((p_max, 2 * e_pad), jnp.float32),     # per-level concat
        ],
    )(leaf_pad, wcat, bt, wc, bc)
    return out[:, :output_dim]


# ----------------------------------------------------------------------------
# Host-side glue: tree linearization (static structure) + level grouping.
# ----------------------------------------------------------------------------
def linearize_tree(tree):
    """Post-order walk of a nested-tuple binary tree (nltk.Tree stand-in).

    Returns (leaf_tokens, internal) with internal[j] = (left_ref, right_ref,
    level); refs are ('leaf', k, 0) or ('node', j, level); leaves at level 0.
    """
    leaf_tokens = []
    internal = []

    def rec(t):
        if isinstance(t, str):
            leaf_tokens.append(t)
            return ("leaf", len(leaf_tokens) - 1, 0)
        if len(t) == 1:                       # unary node: pass-through
            return rec(t[0])
        l = rec(t[0])
        r = rec(t[1])
        lvl = max(l[2], r[2]) + 1
        internal.append((l, r, lvl))
        return ("node", len(internal) - 1, lvl)

    rec(tree)
    return leaf_tokens, internal


def build_levels(leaf_tokens, internal, sublane=8):
    """Row layout: leaves at rows [0, L); internal nodes grouped by level in
    contiguous, sublane-aligned blocks.  All nodes in one level are independent
    -> one batched matmul per level.  Padded slots reference leaf 0 (computed
    but never read).  Returns (levels, total_rows, p_max)."""
    num_leaves = len(leaf_tokens)
    if not internal:
        return [], _round_up(max(num_leaves, 1), sublane), sublane

    max_lvl = max(lvl for _, _, lvl in internal)
    by_level = [[] for _ in range(max_lvl + 1)]
    for j, (_, _, lvl) in enumerate(internal):
        by_level[lvl].append(j)
    assert len(by_level[max_lvl]) == 1           # root is the unique deepest node

    node_row = {}
    base = _round_up(num_leaves, sublane)
    levels, p_max = [], sublane

    def resolve(ref):
        kind, idx = ref[0], ref[1]
        return idx if kind == "leaf" else node_row[idx]

    for lvl in range(1, max_lvl + 1):
        members = by_level[lvl]
        p = _round_up(len(members), sublane)
        p_max = max(p_max, p)
        pairs = []
        for slot, j in enumerate(members):
            l, r, _ = internal[j]
            node_row[j] = base + slot
            pairs.append((resolve(l), resolve(r)))
        pairs += [(0, 0)] * (p - len(members))
        levels.append((base, pairs))
        base += p
    return levels, base, p_max


def reference_forward(leaf_emb, internal, w_tree, b_tree, w_cls, b_cls):
    """Pure-JAX per-node reference matching the torch module exactly."""
    leaf_reps = [leaf_emb[i:i + 1] for i in range(leaf_emb.shape[0])]
    node_reps = []

    def get(ref):
        kind, idx = ref[0], ref[1]
        return leaf_reps[idx] if kind == "leaf" else node_reps[idx]

    for (l, r, _) in internal:
        combined = jnp.concatenate([get(l), get(r)], axis=1)
        node_reps.append(jnp.tanh(combined @ w_tree.T + b_tree))
    root = node_reps[-1] if node_reps else leaf_reps[0]
    return root @ w_cls.T + b_cls


# ----------------------------------------------------------------------------
if __name__ == "__main__":
    # Model config (synthetic, deterministic init).
    vocab = ["$UNK", "the", "cat", "sat", "on", "mat", "dog"]
    vocab_lookup = dict(zip(vocab, range(len(vocab))))
    embed_dim = 32
    hidden_dim = embed_dim * 2
    output_dim = 3

    key = jax.random.PRNGKey(0)
    k_emb, k_wt, k_bt, k_wc, k_bc = jax.random.split(key, 5)

    embedding = jax.random.normal(k_emb, (len(vocab), embed_dim),
                                  dtype=jnp.float32) * 0.1
    lim_t = 1.0 / math.sqrt(hidden_dim)
    w_tree = jax.random.uniform(k_wt, (embed_dim, hidden_dim),
                                minval=-lim_t, maxval=lim_t, dtype=jnp.float32)
    b_tree = jax.random.uniform(k_bt, (embed_dim,),
                                minval=-lim_t, maxval=lim_t, dtype=jnp.float32)
    lim_c = 1.0 / math.sqrt(embed_dim)
    w_cls = jax.random.uniform(k_wc, (output_dim, embed_dim),
                               minval=-lim_c, maxval=lim_c, dtype=jnp.float32)
    b_cls = jax.random.uniform(k_bc, (output_dim,),
                               minval=-lim_c, maxval=lim_c, dtype=jnp.float32)

    # A small binary tree (nltk.tree.Tree stand-in as nested tuples).
    tree = (("the", "cat"), ("sat", ("on", "mat")))
    leaf_tokens, internal = linearize_tree(tree)
    levels_struct = build_levels(leaf_tokens, internal)

    # Embedding lookup (glue, like nn.Embedding).
    leaf_ids = jnp.array(
        [vocab_lookup.get(t, vocab_lookup["$UNK"]) for t in leaf_tokens],
        dtype=jnp.int32)
    leaf_emb = jnp.take(embedding, leaf_ids, axis=0)          # [num_leaves, E]

    ref = reference_forward(leaf_emb, internal, w_tree, b_tree, w_cls, b_cls)

    # f32 matmul operands: strict check.
    out_f32 = tree_nn_forward(leaf_emb, levels_struct, w_tree, b_tree,
                              w_cls, b_cls, compute_dtype=jnp.float32)
    out_f32 = jax.block_until_ready(out_f32)
    assert out_f32.shape == (1, output_dim)
    assert jnp.allclose(out_f32, ref, atol=1e-4, rtol=1e-4), (out_f32, ref)

    # bf16 matmul operands (f32 accumulation + f32 node buffer): loose check.
    out_bf16 = tree_nn_forward(leaf_emb, levels_struct, w_tree, b_tree,
                               w_cls, b_cls, compute_dtype=jnp.bfloat16)
    out_bf16 = jax.block_until_ready(out_bf16)
    assert jnp.allclose(out_bf16, ref, atol=5e-2, rtol=5e-2), (out_bf16, ref)

    print("KERNEL_OK")
</pallas_src>

<mosaic_0001>
module attributes {stable_mosaic.version = 11 : i64} {
  func.func @kernel(%arg0: memref<5x128xf32, #tpu.memory_space<vmem>>, %arg1: memref<256x128xf32, #tpu.memory_space<vmem>>, %arg2: memref<1x128xf32, #tpu.memory_space<vmem>>, %arg3: memref<128x128xf32, #tpu.memory_space<vmem>>, %arg4: memref<1x128xf32, #tpu.memory_space<vmem>>, %arg5: memref<1x128xf32, #tpu.memory_space<vmem>>, %arg6: memref<32x128xf32, #tpu.memory_space<vmem>>, %arg7: memref<8x256xf32, #tpu.memory_space<vmem>>) attributes {dimension_semantics = [], scalar_prefetch = 0 : i64, scratch_operands = 2 : i64, tpu.core_type = #tpu.core_type<tc>} {
    %c0 = arith.constant 0 : index
    %c0_0 = arith.constant 0 : index
    %0 = vector.load %arg0[%c0, %c0_0] : memref<5x128xf32, #tpu.memory_space<vmem>>, vector<5x128xf32>
    %c0_1 = arith.constant 0 : index
    %c0_2 = arith.constant 0 : index
    %1 = vector.load %arg6[%c0_1, %c0_2] : memref<32x128xf32, #tpu.memory_space<vmem>>, vector<5x128xf32>
    tpu.vector_store %arg6[%c0_1, %c0_2], %0 {strides = array<i32>} : memref<32x128xf32, #tpu.memory_space<vmem>>, vector<5x128xf32>,
    %c0_3 = arith.constant 0 : index
    %c0_4 = arith.constant 0 : index
    %2 = vector.load %arg2[%c0_3, %c0_4] : memref<1x128xf32, #tpu.memory_space<vmem>>, vector<1x128xf32>
    %c0_5 = arith.constant 0 : index
    %c0_6 = arith.constant 0 : index
    %3 = vector.load %arg6[%c0_5, %c0_6] : memref<32x128xf32, #tpu.memory_space<vmem>>, vector<1x128xf32>
    %c0_7 = arith.constant 0 : index
    %c0_8 = arith.constant 0 : index
    %4 = vector.load %arg7[%c0_7, %c0_8] : memref<8x256xf32, #tpu.memory_space<vmem>>, vector<1x128xf32>
    tpu.vector_store %arg7[%c0_7, %c0_8], %3 {strides = array<i32>} : memref<8x256xf32, #tpu.memory_space<vmem>>, vector<1x128xf32>,
    %c1 = arith.constant 1 : index
    %c0_9 = arith.constant 0 : index
    %5 = vector.load %arg6[%c1, %c0_9] : memref<32x128xf32, #tpu.memory_space<vmem>>, vector<1x128xf32>
    %c0_10 = arith.constant 0 : index
    %c128 = arith.constant 128 : index
    %6 = vector.load %arg7[%c0_10, %c128] : memref<8x256xf32, #tpu.memory_space<vmem>>, vector<1x128xf32>
    tpu.vector_store %arg7[%c0_10, %c128], %5 {strides = array<i32>} : memref<8x256xf32, #tpu.memory_space<vmem>>, vector<1x128xf32>,
    %c3 = arith.constant 3 : index
    %c0_11 = arith.constant 0 : index
    %7 = vector.load %arg6[%c3, %c0_11] : memref<32x128xf32, #tpu.memory_space<vmem>>, vector<1x128xf32>
    %c1_12 = arith.constant 1 : index
    %c0_13 = arith.constant 0 : index
    %8 = vector.load %arg7[%c1_12, %c0_13] : memref<8x256xf32, #tpu.memory_space<vmem>>, vector<1x128xf32>
    tpu.vector_store %arg7[%c1_12, %c0_13], %7 {strides = array<i32>} : memref<8x256xf32, #tpu.memory_space<vmem>>, vector<1x128xf32>,
    %c4 = arith.constant 4 : index
    %c0_14 = arith.constant 0 : index
    %9 = vector.load %arg6[%c4, %c0_14] : memref<32x128xf32, #tpu.memory_space<vmem>>, vector<1x128xf32>
    %c1_15 = arith.constant 1 : index
    %c128_16 = arith.constant 128 : index
    %10 = vector.load %arg7[%c1_15, %c128_16] : memref<8x256xf32, #tpu.memory_space<vmem>>, vector<1x128xf32>
    tpu.vector_store %arg7[%c1_15, %c128_16], %9 {strides = array<i32>} : memref<8x256xf32, #tpu.memory_space<vmem>>, vector<1x128xf32>,
    %c0_17 = arith.constant 0 : index
    %c0_18 = arith.constant 0 : index
    %11 = vector.load %arg6[%c0_17, %c0_18] : memref<32x128xf32, #tpu.memory_space<vmem>>, vector<1x128xf32>
    %c2 = arith.constant 2 : index
    %c0_19 = arith.constant 0 : index
    %12 = vector.load %arg7[%c2, %c0_19] : memref<8x256xf32, #tpu.memory_space<vmem>>, vector<1x128xf32>
    tpu.vector_store %arg7[%c2, %c0_19], %11 {strides = array<i32>} : memref<8x256xf32, #tpu.memory_space<vmem>>, vector<1x128xf32>,
    %c0_20 = arith.constant 0 : index
    %c0_21 = arith.constant 0 : index
    %13 = vector.load %arg6[%c0_20, %c0_21] : memref<32x128xf32, #tpu.memory_space<vmem>>, vector<1x128xf32>
    %c2_22 = arith.constant 2 : index
    %c128_23 = arith.constant 128 : index
    %14 = vector.load %arg7[%c2_22, %c128_23] : memref<8x256xf32, #tpu.memory_space<vmem>>, vector<1x128xf32>
    tpu.vector_store %arg7[%c2_22, %c128_23], %13 {strides = array<i32>} : memref<8x256xf32, #tpu.memory_space<vmem>>, vector<1x128xf32>,
    %c0_24 = arith.constant 0 : index
    %c0_25 = arith.constant 0 : index
    %15 = vector.load %arg6[%c0_24, %c0_25] : memref<32x128xf32, #tpu.memory_space<vmem>>, vector<1x128xf32>
    %c3_26 = arith.constant 3 : index
    %c0_27 = arith.constant 0 : index
    %16 = vector.load %arg7[%c3_26, %c0_27] : memref<8x256xf32, #tpu.memory_space<vmem>>, vector<1x128xf32>
    tpu.vector_store %arg7[%c3_26, %c0_27], %15 {strides = array<i32>} : memref<8x256xf32, #tpu.memory_space<vmem>>, vector<1x128xf32>,
    %c0_28 = arith.constant 0 : index
    %c0_29 = arith.constant 0 : index
    %17 = vector.load %arg6[%c0_28, %c0_29] : memref<32x128xf32, #tpu.memory_space<vmem>>, vector<1x128xf32>
    %c3_30 = arith.constant 3 : index
    %c128_31 = arith.constant 128 : index
    %18 = vector.load %arg7[%c3_30, %c128_31] : memref<8x256xf32, #tpu.memory_space<vmem>>, vector<1x128xf32>
    tpu.vector_store %arg7[%c3_30, %c128_31], %17 {strides = array<i32>} : memref<8x256xf32, #tpu.memory_space<vmem>>, vector<1x128xf32>,
    %c0_32 = arith.constant 0 : index
    %c0_33 = arith.constant 0 : index
    %19 = vector.load %arg6[%c0_32, %c0_33] : memref<32x128xf32, #tpu.memory_space<vmem>>, vector<1x128xf32>
    %c4_34 = arith.constant 4 : index
    %c0_35 = arith.constant 0 : index
    %20 = vector.load %arg7[%c4_34, %c0_35] : memref<8x256xf32, #tpu.memory_space<vmem>>, vector<1x128xf32>
    tpu.vector_store %arg7[%c4_34, %c0_35], %19 {strides = array<i32>} : memref<8x256xf32, #tpu.memory_space<vmem>>, vector<1x128xf32>,
    %c0_36 = arith.constant 0 : index
    %c0_37 = arith.constant 0 : index
    %21 = vector.load %arg6[%c0_36, %c0_37] : memref<32x128xf32, #tpu.memory_space<vmem>>, vector<1x128xf32>
    %c4_38 = arith.constant 4 : index
    %c128_39 = arith.constant 128 : index
    %22 = vector.load %arg7[%c4_38, %c128_39] : memref<8x256xf32, #tpu.memory_space<vmem>>, vector<1x128xf32>
    tpu.vector_store %arg7[%c4_38, %c128_39], %21 {strides = array<i32>} : memref<8x256xf32, #tpu.memory_space<vmem>>, vector<1x128xf32>,
    %c0_40 = arith.constant 0 : index
    %c0_41 = arith.constant 0 : index
    %23 = vector.load %arg6[%c0_40, %c0_41] : memref<32x128xf32, #tpu.memory_space<vmem>>, vector<1x128xf32>
    %c5 = arith.constant 5 : index
    %c0_42 = arith.constant 0 : index
    %24 = vector.load %arg7[%c5, %c0_42] : memref<8x256xf32, #tpu.memory_space<vmem>>, vector<1x128xf32>
    tpu.vector_store %arg7[%c5, %c0_42], %23 {strides = array<i32>} : memref<8x256xf32, #tpu.memory_space<vmem>>, vector<1x128xf32>,
    %c0_43 = arith.constant 0 : index
    %c0_44 = arith.constant 0 : index
    %25 = vector.load %arg6[%c0_43, %c0_44] : memref<32x128xf32, #tpu.memory_space<vmem>>, vector<1x128xf32>
    %c5_45 = arith.constant 5 : index
    %c128_46 = arith.constant 128 : index
    %26 = vector.load %arg7[%c5_45, %c128_46] : memref<8x256xf32, #tpu.memory_space<vmem>>, vector<1x128xf32>
    tpu.vector_store %arg7[%c5_45, %c128_46], %25 {strides = array<i32>} : memref<8x256xf32, #tpu.memory_space<vmem>>, vector<1x128xf32>,
    %c0_47 = arith.constant 0 : index
    %c0_48 = arith.constant 0 : index
    %27 = vector.load %arg6[%c0_47, %c0_48] : memref<32x128xf32, #tpu.memory_space<vmem>>, vector<1x128xf32>
    %c6 = arith.constant 6 : index
    %c0_49 = arith.constant 0 : index
    %28 = vector.load %arg7[%c6, %c0_49] : memref<8x256xf32, #tpu.memory_space<vmem>>, vector<1x128xf32>
    tpu.vector_store %arg7[%c6, %c0_49], %27 {strides = array<i32>} : memref<8x256xf32, #tpu.memory_space<vmem>>, vector<1x128xf32>,
    %c0_50 = arith.constant 0 : index
    %c0_51 = arith.constant 0 : index
    %29 = vector.load %arg6[%c0_50, %c0_51] : memref<32x128xf32, #tpu.memory_space<vmem>>, vector<1x128xf32>
    %c6_52 = arith.constant 6 : index
    %c128_53 = arith.constant 128 : index
    %30 = vector.load %arg7[%c6_52, %c128_53] : memref<8x256xf32, #tpu.memory_space<vmem>>, vector<1x128xf32>
    tpu.vector_store %arg7[%c6_52, %c128_53], %29 {strides = array<i32>} : memref<8x256xf32, #tpu.memory_space<vmem>>, vector<1x128xf32>,
    %c0_54 = arith.constant 0 : index
    %c0_55 = arith.constant 0 : index
    %31 = vector.load %arg6[%c0_54, %c0_55] : memref<32x128xf32, #tpu.memory_space<vmem>>, vector<1x128xf32>
    %c7 = arith.constant 7 : index
    %c0_56 = arith.constant 0 : index
    %32 = vector.load %arg7[%c7, %c0_56] : memref<8x256xf32, #tpu.memory_space<vmem>>, vector<1x128xf32>
    tpu.vector_store %arg7[%c7, %c0_56], %31 {strides = array<i32>} : memref<8x256xf32, #tpu.memory_space<vmem>>, vector<1x128xf32>,
    %c0_57 = arith.constant 0 : index
    %c0_58 = arith.constant 0 : index
    %33 = vector.load %arg6[%c0_57, %c0_58] : memref<32x128xf32, #tpu.memory_space<vmem>>, vector<1x128xf32>
    %c7_59 = arith.constant 7 : index
    %c128_60 = arith.constant 128 : index
    %34 = vector.load %arg7[%c7_59, %c128_60] : memref<8x256xf32, #tpu.memory_space<vmem>>, vector<1x128xf32>
    tpu.vector_store %arg7[%c7_59, %c128_60], %33 {strides = array<i32>} : memref<8x256xf32, #tpu.memory_space<vmem>>, vector<1x128xf32>,
    %c0_61 = arith.constant 0 : index
    %c0_62 = arith.constant 0 : index
    %35 = vector.load %arg7[%c0_61, %c0_62] : memref<8x256xf32, #tpu.memory_space<vmem>>, vector<8x256xf32>
    %c0_63 = arith.constant 0 : index
    %c0_64 = arith.constant 0 : index
    %36 = vector.load %arg1[%c0_63, %c0_64] : memref<256x128xf32, #tpu.memory_space<vmem>>, vector<256x128xf32>
    %cst = arith.constant dense<0.000000e+00> : vector<8x128xf32>
    %37 = tpu.matmul %35, %36, %cst {dimension_numbers = #tpu.dot_dimension_numbers<[1], [0], [0], [1], [0, 0, 1, 1], [], []>} : vector<8x256xf32>, vector<256x128xf32>, vector<8x128xf32> -> vector<8x128xf32>
    %38 = vector.broadcast %2 : vector<1x128xf32> to vector<8x128xf32>
    %39 = arith.addf %37, %38 : vector<8x128xf32>
    %40 = math.tanh %39 : vector<8x128xf32>
    %c8 = arith.constant 8 : index
    %c0_65 = arith.constant 0 : index
    %41 = vector.load %arg6[%c8, %c0_65] : memref<32x128xf32, #tpu.memory_space<vmem>>, vector<8x128xf32>
    tpu.vector_store %arg6[%c8, %c0_65], %40 {strides = array<i32>} : memref<32x128xf32, #tpu.memory_space<vmem>>, vector<8x128xf32>,
    %c2_66 = arith.constant 2 : index
    %c0_67 = arith.constant 0 : index
    %42 = vector.load %arg6[%c2_66, %c0_67] : memref<32x128xf32, #tpu.memory_space<vmem>>, vector<1x128xf32>
    %c0_68 = arith.constant 0 : index
    %c0_69 = arith.constant 0 : index
    %43 = vector.load %arg7[%c0_68, %c0_69] : memref<8x256xf32, #tpu.memory_space<vmem>>, vector<1x128xf32>
    tpu.vector_store %arg7[%c0_68, %c0_69], %42 {strides = array<i32>} : memref<8x256xf32, #tpu.memory_space<vmem>>, vector<1x128xf32>,
    %c9 = arith.constant 9 : index
    %c0_70 = arith.constant 0 : index
    %44 = vector.load %arg6[%c9, %c0_70] : memref<32x128xf32, #tpu.memory_space<vmem>>, vector<1x128xf32>
    %c0_71 = arith.constant 0 : index
    %c128_72 = arith.constant 128 : index
    %45 = vector.load %arg7[%c0_71, %c128_72] : memref<8x256xf32, #tpu.memory_space<vmem>>, vector<1x128xf32>
    tpu.vector_store %arg7[%c0_71, %c128_72], %44 {strides = array<i32>} : memref<8x256xf32, #tpu.memory_space<vmem>>, vector<1x128xf32>,
    %c0_73 = arith.constant 0 : index
    %c0_74 = arith.constant 0 : index
    %46 = vector.load %arg6[%c0_73, %c0_74] : memref<32x128xf32, #tpu.memory_space<vmem>>, vector<1x128xf32>
    %c1_75 = arith.constant 1 : index
    %c0_76 = arith.constant 0 : index
    %47 = vector.load %arg7[%c1_75, %c0_76] : memref<8x256xf32, #tpu.memory_space<vmem>>, vector<1x128xf32>
    tpu.vector_store %arg7[%c1_75, %c0_76], %46 {strides = array<i32>} : memref<8x256xf32, #tpu.memory_space<vmem>>, vector<1x128xf32>,
    %c0_77 = arith.constant 0 : index
    %c0_78 = arith.constant 0 : index
    %48 = vector.load %arg6[%c0_77, %c0_78] : memref<32x128xf32, #tpu.memory_space<vmem>>, vector<1x128xf32>
    %c1_79 = arith.constant 1 : index
    %c128_80 = arith.constant 128 : index
    %49 = vector.load %arg7[%c1_79, %c128_80] : memref<8x256xf32, #tpu.memory_space<vmem>>, vector<1x128xf32>
    tpu.vector_store %arg7[%c1_79, %c128_80], %48 {strides = array<i32>} : memref<8x256xf32, #tpu.memory_space<vmem>>, vector<1x128xf32>,
    %c0_81 = arith.constant 0 : index
    %c0_82 = arith.constant 0 : index
    %50 = vector.load %arg6[%c0_81, %c0_82] : memref<32x128xf32, #tpu.memory_space<vmem>>, vector<1x128xf32>
    %c2_83 = arith.constant 2 : index
    %c0_84 = arith.constant 0 : index
    %51 = vector.load %arg7[%c2_83, %c0_84] : memref<8x256xf32, #tpu.memory_space<vmem>>, vector<1x128xf32>
    tpu.vector_store %arg7[%c2_83, %c0_84], %50 {strides = array<i32>} : memref<8x256xf32, #tpu.memory_space<vmem>>, vector<1x128xf32>,
    %c0_85 = arith.constant 0 : index
    %c0_86 = arith.constant 0 : index
    %52 = vector.load %arg6[%c0_85, %c0_86] : memref<32x128xf32, #tpu.memory_space<vmem>>, vector<1x128xf32>
    %c2_87 = arith.constant 2 : index
    %c128_88 = arith.constant 128 : index
    %53 = vector.load %arg7[%c2_87, %c128_88] : memref<8x256xf32, #tpu.memory_space<vmem>>, vector<1x128xf32>
    tpu.vector_store %arg7[%c2_87, %c128_88], %52 {strides = array<i32>} : memref<8x256xf32, #tpu.memory_space<vmem>>, vector<1x128xf32>,
    %c0_89 = arith.constant 0 : index
    %c0_90 = arith.constant 0 : index
    %54 = vector.load %arg6[%c0_89, %c0_90] : memref<32x128xf32, #tpu.memory_space<vmem>>, vector<1x128xf32>
    %c3_91 = arith.constant 3 : index
    %c0_92 = arith.constant 0 : index
    %55 = vector.load %arg7[%c3_91, %c0_92] : memref<8x256xf32, #tpu.memory_space<vmem>>, vector<1x128xf32>
    tpu.vector_store %arg7[%c3_91, %c0_92], %54 {strides = array<i32>} : memref<8x256xf32, #tpu.memory_space<vmem>>, vector<1x128xf32>,
    %c0_93 = arith.constant 0 : index
    %c0_94 = arith.constant 0 : index
    %56 = vector.load %arg6[%c0_93, %c0_94] : memref<32x128xf32, #tpu.memory_space<vmem>>, vector<1x128xf32>
    %c3_95 = arith.constant 3 : index
    %c128_96 = arith.constant 128 : index
    %57 = vector.load %arg7[%c3_95, %c128_96] : memref<8x256xf32, #tpu.memory_space<vmem>>, vector<1x128xf32>
    tpu.vector_store %arg7[%c3_95, %c128_96], %56 {strides = array<i32>} : memref<8x256xf32, #tpu.memory_space<vmem>>, vector<1x128xf32>,
    %c0_97 = arith.constant 0 : index
    %c0_98 = arith.constant 0 : index
    %58 = vector.load %arg6[%c0_97, %c0_98] : memref<32x128xf32, #tpu.memory_space<vmem>>, vector<1x128xf32>
    %c4_99 = arith.constant 4 : index
    %c0_100 = arith.constant 0 : index
    %59 = vector.load %arg7[%c4_99, %c0_100] : memref<8x256xf32, #tpu.memory_space<vmem>>, vector<1x128xf32>
    tpu.vector_store %arg7[%c4_99, %c0_100], %58 {strides = array<i32>} : memref<8x256xf32, #tpu.memory_space<vmem>>, vector<1x128xf32>,
    %c0_101 = arith.constant 0 : index
    %c0_102 = arith.constant 0 : index
    %60 = vector.load %arg6[%c0_101, %c0_102] : memref<32x128xf32, #tpu.memory_space<vmem>>, vector<1x128xf32>
    %c4_103 = arith.constant 4 : index
    %c128_104 = arith.constant 128 : index
    %61 = vector.load %arg7[%c4_103, %c128_104] : memref<8x256xf32, #tpu.memory_space<vmem>>, vector<1x128xf32>
    tpu.vector_store %arg7[%c4_103, %c128_104], %60 {strides = array<i32>} : memref<8x256xf32, #tpu.memory_space<vmem>>, vector<1x128xf32>,
    %c0_105 = arith.constant 0 : index
    %c0_106 = arith.constant 0 : index
    %62 = vector.load %arg6[%c0_105, %c0_106] : memref<32x128xf32, #tpu.memory_space<vmem>>, vector<1x128xf32>
    %c5_107 = arith.constant 5 : index
    %c0_108 = arith.constant 0 : index
    %63 = vector.load %arg7[%c5_107, %c0_108] : memref<8x256xf32, #tpu.memory_space<vmem>>, vector<1x128xf32>
    tpu.vector_store %arg7[%c5_107, %c0_108], %62 {strides = array<i32>} : memref<8x256xf32, #tpu.memory_space<vmem>>, vector<1x128xf32>,
    %c0_109 = arith.constant 0 : index
    %c0_110 = arith.constant 0 : index
    %64 = vector.load %arg6[%c0_109, %c0_110] : memref<32x128xf32, #tpu.memory_space<vmem>>, vector<1x128xf32>
    %c5_111 = arith.constant 5 : index
    %c128_112 = arith.constant 128 : index
    %65 = vector.load %arg7[%c5_111, %c128_112] : memref<8x256xf32, #tpu.memory_space<vmem>>, vector<1x128xf32>
    tpu.vector_store %arg7[%c5_111, %c128_112], %64 {strides = array<i32>} : memref<8x256xf32, #tpu.memory_space<vmem>>, vector<1x128xf32>,
    %c0_113 = arith.constant 0 : index
    %c0_114 = arith.constant 0 : index
    %66 = vector.load %arg6[%c0_113, %c0_114] : memref<32x128xf32, #tpu.memory_space<vmem>>, vector<1x128xf32>
    %c6_115 = arith.constant 6 : index
    %c0_116 = arith.constant 0 : index
    %67 = vector.load %arg7[%c6_115, %c0_116] : memref<8x256xf32, #tpu.memory_space<vmem>>, vector<1x128xf32>
    tpu.vector_store %arg7[%c6_115, %c0_116], %66 {strides = array<i32>} : memref<8x256xf32, #tpu.memory_space<vmem>>, vector<1x128xf32>,
    %c0_117 = arith.constant 0 : index
    %c0_118 = arith.constant 0 : index
    %68 = vector.load %arg6[%c0_117, %c0_118] : memref<32x128xf32, #tpu.memory_space<vmem>>, vector<1x128xf32>
    %c6_119 = arith.constant 6 : index
    %c128_120 = arith.constant 128 : index
    %69 = vector.load %arg7[%c6_119, %c128_120] : memref<8x256xf32, #tpu.memory_space<vmem>>, vector<1x128xf32>
    tpu.vector_store %arg7[%c6_119, %c128_120], %68 {strides = array<i32>} : memref<8x256xf32, #tpu.memory_space<vmem>>, vector<1x128xf32>,
    %c0_121 = arith.constant 0 : index
    %c0_122 = arith.constant 0 : index
    %70 = vector.load %arg6[%c0_121, %c0_122] : memref<32x128xf32, #tpu.memory_space<vmem>>, vector<1x128xf32>
    %c7_123 = arith.constant 7 : index
    %c0_124 = arith.constant 0 : index
    %71 = vector.load %arg7[%c7_123, %c0_124] : memref<8x256xf32, #tpu.memory_space<vmem>>, vector<1x128xf32>
    tpu.vector_store %arg7[%c7_123, %c0_124], %70 {strides = array<i32>} : memref<8x256xf32, #tpu.memory_space<vmem>>, vector<1x128xf32>,
    %c0_125 = arith.constant 0 : index
    %c0_126 = arith.constant 0 : index
    %72 = vector.load %arg6[%c0_125, %c0_126] : memref<32x128xf32, #tpu.memory_space<vmem>>, vector<1x128xf32>
    %c7_127 = arith.constant 7 : index
    %c128_128 = arith.constant 128 : index
    %73 = vector.load %arg7[%c7_127, %c128_128] : memref<8x256xf32, #tpu.memory_space<vmem>>, vector<1x128xf32>
    tpu.vector_store %arg7[%c7_127, %c128_128], %72 {strides = array<i32>} : memref<8x256xf32, #tpu.memory_space<vmem>>, vector<1x128xf32>,
    %c0_129 = arith.constant 0 : index
    %c0_130 = arith.constant 0 : index
    %74 = vector.load %arg7[%c0_129, %c0_130] : memref<8x256xf32, #tpu.memory_space<vmem>>, vector<8x256xf32>
    %c0_131 = arith.constant 0 : index
    %c0_132 = arith.constant 0 : index
    %75 = vector.load %arg1[%c0_131, %c0_132] : memref<256x128xf32, #tpu.memory_space<vmem>>, vector<256x128xf32>
    %cst_133 = arith.constant dense<0.000000e+00> : vector<8x128xf32>
    %76 = tpu.matmul %74, %75, %cst_133 {dimension_numbers = #tpu.dot_dimension_numbers<[1], [0], [0], [1], [0, 0, 1, 1], [], []>} : vector<8x256xf32>, vector<256x128xf32>, vector<8x128xf32> -> vector<8x128xf32>
    %77 = vector.broadcast %2 : vector<1x128xf32> to vector<8x128xf32>
    %78 = arith.addf %76, %77 : vector<8x128xf32>
    %79 = math.tanh %78 : vector<8x128xf32>
    %c16 = arith.constant 16 : index
    %c0_134 = arith.constant 0 : index
    %80 = vector.load %arg6[%c16, %c0_134] : memref<32x128xf32, #tpu.memory_space<vmem>>, vector<8x128xf32>
    tpu.vector_store %arg6[%c16, %c0_134], %79 {strides = array<i32>} : memref<32x128xf32, #tpu.memory_space<vmem>>, vector<8x128xf32>,
    %c8_135 = arith.constant 8 : index
    %c0_136 = arith.constant 0 : index
    %81 = vector.load %arg6[%c8_135, %c0_136] : memref<32x128xf32, #tpu.memory_space<vmem>>, vector<1x128xf32>
    %c0_137 = arith.constant 0 : index
    %c0_138 = arith.constant 0 : index
    %82 = vector.load %arg7[%c0_137, %c0_138] : memref<8x256xf32, #tpu.memory_space<vmem>>, vector<1x128xf32>
    tpu.vector_store %arg7[%c0_137, %c0_138], %81 {strides = array<i32>} : memref<8x256xf32, #tpu.memory_space<vmem>>, vector<1x128xf32>,
    %c16_139 = arith.constant 16 : index
    %c0_140 = arith.constant 0 : index
    %83 = vector.load %arg6[%c16_139, %c0_140] : memref<32x128xf32, #tpu.memory_space<vmem>>, vector<1x128xf32>
    %c0_141 = arith.constant 0 : index
    %c128_142 = arith.constant 128 : index
    %84 = vector.load %arg7[%c0_141, %c128_142] : memref<8x256xf32, #tpu.memory_space<vmem>>, vector<1x128xf32>
    tpu.vector_store %arg7[%c0_141, %c128_142], %83 {strides = array<i32>} : memref<8x256xf32, #tpu.memory_space<vmem>>, vector<1x128xf32>,
    %c0_143 = arith.constant 0 : index
    %c0_144 = arith.constant 0 : index
    %85 = vector.load %arg6[%c0_143, %c0_144] : memref<32x128xf32, #tpu.memory_space<vmem>>, vector<1x128xf32>
    %c1_145 = arith.constant 1 : index
    %c0_146 = arith.constant 0 : index
    %86 = vector.load %arg7[%c1_145, %c0_146] : memref<8x256xf32, #tpu.memory_space<vmem>>, vector<1x128xf32>
    tpu.vector_store %arg7[%c1_145, %c0_146], %85 {strides = array<i32>} : memref<8x256xf32, #tpu.memory_space<vmem>>, vector<1x128xf32>,
    %c0_147 = arith.constant 0 : index
    %c0_148 = arith.constant 0 : index
    %87 = vector.load %arg6[%c0_147, %c0_148] : memref<32x128xf32, #tpu.memory_space<vmem>>, vector<1x128xf32>
    %c1_149 = arith.constant 1 : index
    %c128_150 = arith.constant 128 : index
    %88 = vector.load %arg7[%c1_149, %c128_150] : memref<8x256xf32, #tpu.memory_space<vmem>>, vector<1x128xf32>
    tpu.vector_store %arg7[%c1_149, %c128_150], %87 {strides = array<i32>} : memref<8x256xf32, #tpu.memory_space<vmem>>, vector<1x128xf32>,
    %c0_151 = arith.constant 0 : index
    %c0_152 = arith.constant 0 : index
    %89 = vector.load %arg6[%c0_151, %c0_152] : memref<32x128xf32, #tpu.memory_space<vmem>>, vector<1x128xf32>
    %c2_153 = arith.constant 2 : index
    %c0_154 = arith.constant 0 : index
    %90 = vector.load %arg7[%c2_153, %c0_154] : memref<8x256xf32, #tpu.memory_space<vmem>>, vector<1x128xf32>
    tpu.vector_store %arg7[%c2_153, %c0_154], %89 {strides = array<i32>} : memref<8x256xf32, #tpu.memory_space<vmem>>, vector<1x128xf32>,
    %c0_155 = arith.constant 0 : index
    %c0_156 = arith.constant 0 : index
    %91 = vector.load %arg6[%c0_155, %c0_156] : memref<32x128xf32, #tpu.memory_space<vmem>>, vector<1x128xf32>
    %c2_157 = arith.constant 2 : index
    %c128_158 = arith.constant 128 : index
    %92 = vector.load %arg7[%c2_157, %c128_158] : memref<8x256xf32, #tpu.memory_space<vmem>>, vector<1x128xf32>
    tpu.vector_store %arg7[%c2_157, %c128_158], %91 {strides = array<i32>} : memref<8x256xf32, #tpu.memory_space<vmem>>, vector<1x128xf32>,
    %c0_159 = arith.constant 0 : index
    %c0_160 = arith.constant 0 : index
    %93 = vector.load %arg6[%c0_159, %c0_160] : memref<32x128xf32, #tpu.memory_space<vmem>>, vector<1x128xf32>
    %c3_161 = arith.constant 3 : index
    %c0_162 = arith.constant 0 : index
    %94 = vector.load %arg7[%c3_161, %c0_162] : memref<8x256xf32, #tpu.memory_space<vmem>>, vector<1x128xf32>
    tpu.vector_store %arg7[%c3_161, %c0_162], %93 {strides = array<i32>} : memref<8x256xf32, #tpu.memory_space<vmem>>, vector<1x128xf32>,
    %c0_163 = arith.constant 0 : index
    %c0_164 = arith.constant 0 : index
    %95 = vector.load %arg6[%c0_163, %c0_164] : memref<32x128xf32, #tpu.memory_space<vmem>>, vector<1x128xf32>
    %c3_165 = arith.constant 3 : index
    %c128_166 = arith.constant 128 : index
    %96 = vector.load %arg7[%c3_165, %c128_166] : memref<8x256xf32, #tpu.memory_space<vmem>>, vector<1x128xf32>
    tpu.vector_store %arg7[%c3_165, %c128_166], %95 {strides = array<i32>} : memref<8x256xf32, #tpu.memory_space<vmem>>, vector<1x128xf32>,
    %c0_167 = arith.constant 0 : index
    %c0_168 = arith.constant 0 : index
    %97 = vector.load %arg6[%c0_167, %c0_168] : memref<32x128xf32, #tpu.memory_space<vmem>>, vector<1x128xf32>
    %c4_169 = arith.constant 4 : index
    %c0_170 = arith.constant 0 : index
    %98 = vector.load %arg7[%c4_169, %c0_170] : memref<8x256xf32, #tpu.memory_space<vmem>>, vector<1x128xf32>
    tpu.vector_store %arg7[%c4_169, %c0_170], %97 {strides = array<i32>} : memref<8x256xf32, #tpu.memory_space<vmem>>, vector<1x128xf32>,
    %c0_171 = arith.constant 0 : index
    %c0_172 = arith.constant 0 : index
    %99 = vector.load %arg6[%c0_171, %c0_172] : memref<32x128xf32, #tpu.memory_space<vmem>>, vector<1x128xf32>
    %c4_173 = arith.constant 4 : index
    %c128_174 = arith.constant 128 : index
    %100 = vector.load %arg7[%c4_173, %c128_174] : memref<8x256xf32, #tpu.memory_space<vmem>>, vector<1x128xf32>
    tpu.vector_store %arg7[%c4_173, %c128_174], %99 {strides = array<i32>} : memref<8x256xf32, #tpu.memory_space<vmem>>, vector<1x128xf32>,
    %c0_175 = arith.constant 0 : index
    %c0_176 = arith.constant 0 : index
    %101 = vector.load %arg6[%c0_175, %c0_176] : memref<32x128xf32, #tpu.memory_space<vmem>>, vector<1x128xf32>
    %c5_177 = arith.constant 5 : index
    %c0_178 = arith.constant 0 : index
    %102 = vector.load %arg7[%c5_177, %c0_178] : memref<8x256xf32, #tpu.memory_space<vmem>>, vector<1x128xf32>
    tpu.vector_store %arg7[%c5_177, %c0_178], %101 {strides = array<i32>} : memref<8x256xf32, #tpu.memory_space<vmem>>, vector<1x128xf32>,
    %c0_179 = arith.constant 0 : index
    %c0_180 = arith.constant 0 : index
    %103 = vector.load %arg6[%c0_179, %c0_180] : memref<32x128xf32, #tpu.memory_space<vmem>>, vector<1x128xf32>
    %c5_181 = arith.constant 5 : index
    %c128_182 = arith.constant 128 : index
    %104 = vector.load %arg7[%c5_181, %c128_182] : memref<8x256xf32, #tpu.memory_space<vmem>>, vector<1x128xf32>
    tpu.vector_store %arg7[%c5_181, %c128_182], %103 {strides = array<i32>} : memref<8x256xf32, #tpu.memory_space<vmem>>, vector<1x128xf32>,
    %c0_183 = arith.constant 0 : index
    %c0_184 = arith.constant 0 : index
    %105 = vector.load %arg6[%c0_183, %c0_184] : memref<32x128xf32, #tpu.memory_space<vmem>>, vector<1x128xf32>
    %c6_185 = arith.constant 6 : index
    %c0_186 = arith.constant 0 : index
    %106 = vector.load %arg7[%c6_185, %c0_186] : memref<8x256xf32, #tpu.memory_space<vmem>>, vector<1x128xf32>
    tpu.vector_store %arg7[%c6_185, %c0_186], %105 {strides = array<i32>} : memref<8x256xf32, #tpu.memory_space<vmem>>, vector<1x128xf32>,
    %c0_187 = arith.constant 0 : index
    %c0_188 = arith.constant 0 : index
    %107 = vector.load %arg6[%c0_187, %c0_188] : memref<32x128xf32, #tpu.memory_space<vmem>>, vector<1x128xf32>
    %c6_189 = arith.constant 6 : index
    %c128_190 = arith.constant 128 : index
    %108 = vector.load %arg7[%c6_189, %c128_190] : memref<8x256xf32, #tpu.memory_space<vmem>>, vector<1x128xf32>
    tpu.vector_store %arg7[%c6_189, %c128_190], %107 {strides = array<i32>} : memref<8x256xf32, #tpu.memory_space<vmem>>, vector<1x128xf32>,
    %c0_191 = arith.constant 0 : index
    %c0_192 = arith.constant 0 : index
    %109 = vector.load %arg6[%c0_191, %c0_192] : memref<32x128xf32, #tpu.memory_space<vmem>>, vector<1x128xf32>
    %c7_193 = arith.constant 7 : index
    %c0_194 = arith.constant 0 : index
    %110 = vector.load %arg7[%c7_193, %c0_194] : memref<8x256xf32, #tpu.memory_space<vmem>>, vector<1x128xf32>
    tpu.vector_store %arg7[%c7_193, %c0_194], %109 {strides = array<i32>} : memref<8x256xf32, #tpu.memory_space<vmem>>, vector<1x128xf32>,
    %c0_195 = arith.constant 0 : index
    %c0_196 = arith.constant 0 : index
    %111 = vector.load %arg6[%c0_195, %c0_196] : memref<32x128xf32, #tpu.memory_space<vmem>>, vector<1x128xf32>
    %c7_197 = arith.constant 7 : index
    %c128_198 = arith.constant 128 : index
    %112 = vector.load %arg7[%c7_197, %c128_198] : memref<8x256xf32, #tpu.memory_space<vmem>>, vector<1x128xf32>
    tpu.vector_store %arg7[%c7_197, %c128_198], %111 {strides = array<i32>} : memref<8x256xf32, #tpu.memory_space<vmem>>, vector<1x128xf32>,
    %c0_199 = arith.constant 0 : index
    %c0_200 = arith.constant 0 : index
    %113 = vector.load %arg7[%c0_199, %c0_200] : memref<8x256xf32, #tpu.memory_space<vmem>>, vector<8x256xf32>
    %c0_201 = arith.constant 0 : index
    %c0_202 = arith.constant 0 : index
    %114 = vector.load %arg1[%c0_201, %c0_202] : memref<256x128xf32, #tpu.memory_space<vmem>>, vector<256x128xf32>
    %cst_203 = arith.constant dense<0.000000e+00> : vector<8x128xf32>
    %115 = tpu.matmul %113, %114, %cst_203 {dimension_numbers = #tpu.dot_dimension_numbers<[1], [0], [0], [1], [0, 0, 1, 1], [], []>} : vector<8x256xf32>, vector<256x128xf32>, vector<8x128xf32> -> vector<8x128xf32>
    %116 = vector.broadcast %2 : vector<1x128xf32> to vector<8x128xf32>
    %117 = arith.addf %115, %116 : vector<8x128xf32>
    %118 = math.tanh %117 : vector<8x128xf32>
    %c24 = arith.constant 24 : index
    %c0_204 = arith.constant 0 : index
    %119 = vector.load %arg6[%c24, %c0_204] : memref<32x128xf32, #tpu.memory_space<vmem>>, vector<8x128xf32>
    tpu.vector_store %arg6[%c24, %c0_204], %118 {strides = array<i32>} : memref<32x128xf32, #tpu.memory_space<vmem>>, vector<8x128xf32>,
    %120 = vector.extract_strided_slice %118 {offsets = [0, 0], sizes = [1, 128], strides = [1, 1]} : vector<8x128xf32> to vector<1x128xf32>
    %c0_205 = arith.constant 0 : index
    %c0_206 = arith.constant 0 : index
    %121 = vector.load %arg3[%c0_205, %c0_206] : memref<128x128xf32, #tpu.memory_space<vmem>>, vector<128x128xf32>
    %cst_207 = arith.constant dense<0.000000e+00> : vector<1x128xf32>
    %122 = tpu.matmul %120, %121, %cst_207 {dimension_numbers = #tpu.dot_dimension_numbers<[1], [0], [0], [1], [0, 0, 1, 1], [], []>} : vector<1x128xf32>, vector<128x128xf32>, vector<1x128xf32> -> vector<1x128xf32>
    %c0_208 = arith.constant 0 : index
    %c0_209 = arith.constant 0 : index
    %123 = vector.load %arg4[%c0_208, %c0_209] : memref<1x128xf32, #tpu.memory_space<vmem>>, vector<1x128xf32>
    %124 = arith.addf %122, %123 : vector<1x128xf32>
    %c0_210 = arith.constant 0 : index
    %c0_211 = arith.constant 0 : index
    %125 = vector.load %arg5[%c0_210, %c0_211] : memref<1x128xf32, #tpu.memory_space<vmem>>, vector<1x128xf32>
    tpu.vector_store %arg5[%c0_210, %c0_211], %124 {strides = array<i32>} : memref<1x128xf32, #tpu.memory_space<vmem>>, vector<1x128xf32>,
    return
  }
}

</mosaic_0001>

<bundles_post_ra>
// kernel: tpu_custom_call.1
= control target key start
LH: loop header
LB: loop body
LE: loop exit
PB: predicated region body
PF: predicated region fallthrough
CT: control target
= control target key end

     0   :  { %10 = vsyncpa [#allocation5], 0  ;;  %s1133_s0 = inlined_call_operand.hbm [shape: f32[5,128], index: 0, kind: input, shape index: {}]   ;;  %s1134_s1 = inlined_call_operand.hbm [shape: f32[256,128], index: 1, kind: input, shape index: {}]   ;;  %s1135_s2 = inlined_call_operand.vmem [shape: f32[1,128], index: 2, kind: input, shape index: {}]   ;;  %s1136_s3 = inlined_call_operand.hbm [shape: f32[128,128], index: 3, kind: input, shape index: {}]   ;;  %s1137_s4 = inlined_call_operand.vmem [shape: f32[1,128], index: 4, kind: input, shape index: {}]   ;;  %s1138_s5 = inlined_call_operand.hbm [shape: f32[1,128], index: 5, kind: output, shape index: {}]  }
   0x1   :  { %11 = vsyncpa [#allocation8], 0 }
   0x2   :  { %12 = vsyncpa [#allocation6], 0  ;;  %s974_s18 = smov [#allocation7]   ;;  %s880_s22 = scalar_lea.hbm %s1134_s1, 4096 }
   0x3   :  { %s28_s19 = sshll.u32 %s974_s18, 4  ;;  %p881_p0 = scmp.ne.s32.totalorder %s1134_s1, %s880_s22  ;;  %s29_s19 = int_to_ptr.vmem [resolvable:$true] %s28_s19 }
   0x4   :  { %p884_p1 = scmp.lt.u32.totalorder %s880_s22, %s1134_s1 }
   0x6   :  { %p886_p2 = pnand %p884_p1, %p881_p0 }
   0x8   :  { %889 = shalt.err (!%p886_p2)
}
   0x9   :  { %s890_s27 = scalar_lea.vmem %s29_s19, 4096  ;;  %p895_p4 = scmp.lt.s32.totalorder %s29_s19, %s29_s19 }
   0xa   :  { %p891_p3 = scmp.ne.s32.totalorder %s29_s19, %s890_s27  ;;  %p896_p5 = scmp.lt.s32.totalorder %s890_s27, %s890_s27 }
   0xc   :  { %p897_p6 = por %p896_p5, %p895_p4 }
   0xe   :  { %p898_p7 = pnand %p897_p6, %p891_p3 }
  0x10   :  { %901 = shalt.err (!%p898_p7)
}
  0x11   :  { %s975_s28 = smov 128   ;;  %s976_s29 = smov 8  }
  0x12   :  { %34 = dma.hbm_to_vmem [thread:$0]  %s1134_s1, 4096, %s29_s19, [#allocation8], %s975_s28, %s975_s28, %s976_s29  }
  0x13   :  { %s977_s7 = smov [#allocation4]   ;;  %s978_s9 = smov [#allocation9]  }
  0x14   :  { %s19_s8 = sshll.u32 %s977_s7, 4  ;;  %s42_s10 = sshll.u32 %s978_s9, 4  ;;  %s20_s8 = int_to_ptr.vmem [resolvable:$true] %s19_s8  ;;  %s43_s10 = int_to_ptr.vmem [resolvable:$true] %s42_s10 }
  0x15   :  { %s902_s13 = scalar_lea.hbm %s1133_s0, 128 }
  0x16   :  { %p903_p8 = scmp.ne.s32.totalorder %s1133_s0, %s902_s13  ;;  %p906_p9 = scmp.lt.u32.totalorder %s902_s13, %s1133_s0 }
  0x18   :  { %p908_p10 = pnand %p906_p9, %p903_p8 }
  0x1a   :  { %911 = shalt.err (!%p908_p10)
}
  0x1b   :  { %s912_s1 = scalar_lea.vmem %s20_s8, 128  ;;  %p917_p12 = scmp.lt.s32.totalorder %s20_s8, %s20_s8 }
  0x1c   :  { %p913_p11 = scmp.ne.s32.totalorder %s20_s8, %s912_s1  ;;  %p918_p13 = scmp.lt.s32.totalorder %s912_s1, %s912_s1 }
  0x1e   :  { %p919_p0 = por %p918_p13, %p917_p12 }
  0x20   :  { %p920_p1 = pnand %p919_p0, %p913_p11 }
  0x22   :  { %923 = shalt.err (!%p920_p1)
}
  0x23   :  { %22 = dma.hbm_to_vmem [thread:$0]  %s1133_s0, 128, %s20_s8, [#allocation5]  }
  0x24   :  { %s924_s22 = scalar_lea.hbm %s1136_s3, 2048 }
  0x25   :  { %p925_p2 = scmp.ne.s32.totalorder %s1136_s3, %s924_s22  ;;  %p928_p3 = scmp.lt.u32.totalorder %s924_s22, %s1136_s3 }
  0x27   :  { %p930_p4 = pnand %p928_p3, %p925_p2 }
  0x29   :  { %933 = shalt.err (!%p930_p4)
}
  0x2a   :  { %s934_s27 = scalar_lea.vmem %s43_s10, 2048  ;;  %p939_p6 = scmp.lt.s32.totalorder %s43_s10, %s43_s10 }
  0x2b   :  { %p935_p5 = scmp.ne.s32.totalorder %s43_s10, %s934_s27  ;;  %p940_p7 = scmp.lt.s32.totalorder %s934_s27, %s934_s27 }
  0x2d   :  { %p941_p8 = por %p940_p7, %p939_p6 }
  0x2f   :  { %p942_p9 = pnand %p941_p8, %p935_p5 }
  0x31   :  { %945 = shalt.err (!%p942_p9)
}
  0x32   :  { %48 = dma.hbm_to_vmem [thread:$0]  %s1136_s3, 2048, %s43_s10, [#allocation8], %s975_s28, %s975_s28, %s976_s29  }
  0x33   :  { %968 = dma.done.wait [#allocation5], 128  }
  0x34   :  { %969 = vsyncadd [#allocation5], 4294967168 }
  0x35   :  { %970 = dma.done.wait [#allocation8], 6144  }
  0x36   :  { %971 = vsyncadd [#allocation8], 4294961152  ;;  %v113_v0 = vld [vmem:[#allocation7 + $0x80] sm:$0xff]  ;;  %v114_v1 = vld [vmem:[#allocation7 + $0x88] sm:$0xff]  ;;  %vm980_vm0 = vmmov 0   ;;  %s982_s6 = smov [#allocation10]  }
  0x37   :  { %v97_v2 = vld [vmem:[#allocation7] sm:$0xff]  ;;  %v1055_v3 = vpack.c.bf16 %v114_v1, %v113_v0  ;;  %v98_v4 = vld [vmem:[#allocation7 + $0x8] sm:$0xff]  ;;  %v115_v5 = vld [vmem:[#allocation7 + $0x90] sm:$0xff]  ;;  %s577_s7 = sshll.u32 %s982_s6, 4  ;;  %s578_s7 = int_to_ptr.vmem [resolvable:$true] %s577_s7 }
  0x38   :  { %v116_v6 = vld [vmem:[#allocation7 + $0x98] sm:$0xff]  ;;  %v1057_v7 = vpack.c.bf16 %v98_v4, %v97_v2  ;;  %v99_v9 = vld [vmem:[#allocation7 + $0x10] sm:$0xff]  ;;  %v117_v11 = vld [vmem:[#allocation7 + $0xa0] sm:$0xff]  ;;  %s946_s8 = scalar_lea.vmem %s578_s7, 16  ;;  %s950_s9 = scalar_lea.vmem %s578_s7, 32 }
  0x39   :  { %v1059_v8 = vpack.c.bf16 %v116_v6, %v115_v5  ;;  %v100_v10 = vld [vmem:[#allocation7 + $0x18] sm:$0xff]  ;;  %746 = vmatprep.subr.bf16.mxu0 %v1055_v3  ;;  %v118_v12 = vld [vmem:[#allocation7 + $0xa8] sm:$0xff]  ;;  %778 = vmatprep.subr.bf16.mxu1 %v1055_v3  ;;  %v101_v15 = vld [vmem:[#allocation7 + $0x20] sm:$0xff]  ;;  %p947_p10 = scmp.ne.s32.totalorder %s578_s7, %s946_s8  ;;  %p951_p11 = scmp.lt.s32.totalorder %s578_s7, %s578_s7 }
  0x3a   :  { %748 = vmatpush3.bf16.msra.mxu0 %v1057_v7  ;;  %v1064_v13 = vpack.c.bf16 %v100_v10, %v99_v9  ;;  %780 = vmatpush3.bf16.msra.mxu1 %v1057_v7  ;;  %v1068_v14 = vpack.c.bf16 %v118_v12, %v117_v11  ;;  %v102_v16 = vld [vmem:[#allocation7 + $0x28] sm:$0xff]  ;;  %v119_v17 = vld [vmem:[#allocation7 + $0xb0] sm:$0xff]  ;;  %v120_v18 = vld [vmem:[#allocation7 + $0xb8] sm:$0xff]  ;;  %p952_p12 = scmp.lt.s32.totalorder %s950_s9, %s946_s8 }
  0x3b   :  { %750 = vmatprep.subr.bf16.mxu0 %v1059_v8  ;;  %782 = vmatprep.subr.bf16.mxu1 %v1059_v8  ;;  %v1072_v19 = vpack.c.bf16 %v102_v16, %v101_v15  ;;  %v1076_v20 = vpack.c.bf16 %v120_v18, %v119_v17  ;;  %v103_v21 = vld [vmem:[#allocation7 + $0x30] sm:$0xff]  ;;  %v104_v22 = vld [vmem:[#allocation7 + $0x38] sm:$0xff]  ;;  %v121_v23 = vld [vmem:[#allocation7 + $0xc0] sm:$0xff] }
  0x3c   :  { %v122_v24 = vld [vmem:[#allocation7 + $0xc8] sm:$0xff]  ;;  %v60_v25 = vld [vmem:[#allocation4] sm:$0x1f]  ;;  %v1080_v26 = vpack.c.bf16 %v104_v22, %v103_v21  ;;  %v105_v28 = vld [vmem:[#allocation7 + $0x40] sm:$0xff]  ;;  %p953_p13 = por %p952_p12, %p951_p11 }
  0x3d   :  { %61 = vst [vmem:[#allocation2] sm:$0x1f] %v60_v25  ;;  %v1084_v27 = vpack.c.bf16 %v122_v24, %v121_v23  ;;  %v106_v29 = vld [vmem:[#allocation7 + $0x48] sm:$0xff]  ;;  %v123_v30 = vld [vmem:[#allocation7 + $0xd0] sm:$0xff]  ;;  %v124_v31 = vld [vmem:[#allocation7 + $0xd8] sm:$0xff] }
  0x3e   :  { %752 = vmatpush3.bf16.msra.mxu0 %v1064_v13  ;;  %784 = vmatpush3.bf16.msra.mxu1 %v1064_v13  ;;  %v1088_v32 = vpack.c.bf16 %v106_v29, %v105_v28  ;;  %v107_v33 = vld [vmem:[#allocation7 + $0x50] sm:$0xff]  ;;  %v1092_v34 = vpack.c.bf16 %v124_v31, %v123_v30  ;;  %v108_v35 = vld [vmem:[#allocation7 + $0x58] sm:$0xff]  ;;  %v125_v36 = vld [vmem:[#allocation7 + $0xe0] sm:$0xff]  ;;  %p954_p0 = pnand %p953_p13, %p947_p10 }
  0x3f   :  { %754 = vmatprep.subr.bf16.mxu0 %v1068_v14  ;;  %786 = vmatprep.subr.bf16.mxu1 %v1068_v14  ;;  %v126_v37 = vld [vmem:[#allocation7 + $0xe8] sm:$0xff]  ;;  %v109_v41 = vld [vmem:[#allocation7 + $0x60] sm:$0xff]  ;;  %v767_v46 = vpack.c.bf16 %v108_v35, %v107_v33  ;;  %v127_v47 = vld [vmem:[#allocation7 + $0xf0] sm:$0xff] }
  0x40   :  { %v110_v42 = vld [vmem:[#allocation7 + $0x68] sm:$0xff]  ;;  %v128_v48 = vld [vmem:[#allocation7 + $0xf8] sm:$0xff]  ;;  %v769_v52 = vpack.c.bf16 %v126_v37, %v125_v36  ;;  %v111_v61 = vld [vmem:[#allocation7 + $0x70] sm:$0xff] }
  0x41   :  { %v771_v59 = vpack.c.bf16 %v110_v42, %v109_v41  ;;  %v773_v60 = vpack.c.bf16 %v128_v48, %v127_v47  ;;  %v112_v62 = vld [vmem:[#allocation7 + $0x78] sm:$0xff]  ;;  %v483_v41 = vld [vmem:[#allocation9] sm:$0xff]  ;;  %v484_v42 = vld [vmem:[#allocation9 + $0x8] sm:$0xff] }
  0x42   :  { %756 = vmatpush3.bf16.msra.mxu0 %v1072_v19  ;;  %788 = vmatpush3.bf16.msra.mxu1 %v1072_v19  ;;  %v775_v63 = vpack.c.bf16 %v112_v62, %v111_v61  ;;  %v487_v48 = vld [vmem:[#allocation9 + $0x20] sm:$0xff] }
  0x43   :  { %758 = vmatprep.subr.bf16.mxu0 %v1076_v20  ;;  %790 = vmatprep.subr.bf16.mxu1 %v1076_v20  ;;  %v491_v62 = vld [vmem:[#allocation9 + $0x40] sm:$0xff] }
  0x44   :  { %v65_v38 = vld [vmem:[#allocation2] sm:$0x3]   ;;  %v69_v39 = vld [vmem:[#allocation2 + $0x4] sm:$0x1]  ;;  %v67_v53 = vld [vmem:[#allocation2 + $0x3] sm:$0x1] }
  0x45   :  { %v73_v40 = vld [vmem:[#allocation2] sm:$0x1]  ;;  %66 = vst [vmem:[#allocation3 + $0x7] sm:$0x3] %v65_v38   ;;  %70 = vst [vmem:[#allocation3 + $0x9] sm:$0x1] %v69_v39 }
  0x46   :  { %760 = vmatpush3.bf16.msra.mxu0 %v1080_v26  ;;  %792 = vmatpush3.bf16.msra.mxu1 %v1080_v26  ;;  %74 = vst [vmem:[#allocation3 + $0xa] sm:$0x1] %v73_v40  ;;  %v77_v43 = vld [vmem:[#allocation2] sm:$0x1]  ;;  %68 = vst [vmem:[#allocation3 + $0x1] sm:$0x1] %v67_v53 }
  0x47   :  { %762 = vmatprep.subr.bf16.mxu0 %v1084_v27  ;;  %794 = vmatprep.subr.bf16.mxu1 %v1084_v27  ;;  %v81_v44 = vld [vmem:[#allocation2] sm:$0x1]  ;;  %78 = vst [vmem:[#allocation3 + $0xb] sm:$0x1] %v77_v43  ;;  %v207_v2 = vld [vmem:[#allocation2 + $0x2] sm:$0x1] }
  0x48   :  { %v85_v45 = vld [vmem:[#allocation2] sm:$0x1]  ;;  %82 = vst [vmem:[#allocation3 + $0xc] sm:$0x1] %v81_v44  ;;  %v485_v43 = vld [vmem:[#allocation9 + $0x10] sm:$0xff]  ;;  %v979_v44 = vmov 0.0|0.0  }
  0x49   :  { %86 = vst [vmem:[#allocation3 + $0xd] sm:$0x1] %v85_v45  ;;  %v89_v49 = vld [vmem:[#allocation2] sm:$0x1]  ;;  %v842_v45 = vpack.c.bf16 %v484_v42, %v483_v41 }
  0x4a   :  { %764 = vmatpush3.bf16.msra.mxu0 %v1088_v32  ;;  %v93_v50 = vld [vmem:[#allocation2] sm:$0x1]  ;;  %796 = vmatpush3.bf16.msra.mxu1 %v1088_v32  ;;  %90 = vst [vmem:[#allocation3 + $0xe] sm:$0x1] %v89_v49 }
  0x4b   :  { %v63_v51 = vld [vmem:[#allocation2] sm:$0x1]  ;;  %766 = vmatprep.subr.bf16.mxu0 %v1092_v34  ;;  %94 = vst [vmem:[#allocation3 + $0xf] sm:$0x1] %v93_v50  ;;  %798 = vmatprep.subr.bf16.mxu1 %v1092_v34 }
  0x4c   :  { %64 = vst [vmem:[#allocation3] sm:$0x1] %v63_v51  ;;  %v71_v54 = vld [vmem:[#allocation2] sm:$0x1]  ;;  %v489_v51 = vld [vmem:[#allocation9 + $0x30] sm:$0xff] }
  0x4d   :  { %v75_v55 = vld [vmem:[#allocation2] sm:$0x1]  ;;  %72 = vst [vmem:[#allocation3 + $0x2] sm:$0x1] %v71_v54 }
  0x4e   :  { %76 = vst [vmem:[#allocation3 + $0x3] sm:$0x1] %v75_v55  ;;  %v79_v56 = vld [vmem:[#allocation2] sm:$0x1]  ;;  %768 = vmatpush3.bf16.msra.mxu0 %v767_v46  ;;  %800 = vmatpush3.bf16.msra.mxu1 %v767_v46 }
  0x4f   :  { %v83_v57 = vld [vmem:[#allocation2] sm:$0x1]  ;;  %80 = vst [vmem:[#allocation3 + $0x4] sm:$0x1] %v79_v56  ;;  %770 = vmatprep.subr.bf16.mxu0 %v769_v52  ;;  %802 = vmatprep.subr.bf16.mxu1 %v769_v52 }
  0x50   :  { %v87_v58 = vld [vmem:[#allocation2] sm:$0x1]  ;;  %84 = vst [vmem:[#allocation3 + $0x5] sm:$0x1] %v83_v57 }
  0x51   :  { %88 = vst [vmem:[#allocation3 + $0x6] sm:$0x1] %v87_v58  ;;  %v215_v4 = vld [vmem:[#allocation2] sm:$0x1] }
  0x52   :  { %772 = vmatpush3.bf16.msra.mxu0 %v771_v59  ;;  %v96_v0 = vld [vmem:[#allocation3 + $0x8] sm:$0xff]  ;;  %804 = vmatpush3.bf16.msra.mxu1 %v771_v59  ;;  %v219_v5 = vld [vmem:[#allocation2] sm:$0x1] }
  0x53   :  { %774 = vmatprep.subr.bf16.mxu0 %v773_v60  ;;  %199 = vmatprep.mubr.f32.mxu0 %v96_v0  ;;  %v223_v6 = vld [vmem:[#allocation2] sm:$0x1] }
  0x54   :  { %806 = vmatprep.subr.bf16.mxu1 %v773_v60  ;;  %v235_v9 = vld [vmem:[#allocation2] sm:$0x1] }
  0x55   :  { %v213_v10 = vld [vmem:[#allocation2] sm:$0x1] }
  0x56   :  { %776 = vmatpush3.bf16.msra.mxu0 %v775_v63  ;;  %808 = vmatpush3.bf16.msra.mxu1 %v775_v63  ;;  %v217_v11 = vld [vmem:[#allocation2] sm:$0x1]  ;;  %214 = vst [vmem:[#allocation3 + $0x9] sm:$0x1] %v213_v10  ;;  %v981_v10 = vmov 0.0  }
  0x57   :  { %810 = vmatprep.subr.bf16.mxu0 %v1055_v3  ;;  %v211_v3 = vld [vmem:[#allocation2] sm:$0x1]  ;;  %218 = vst [vmem:[#allocation3 + $0xa] sm:$0x1] %v217_v11  ;;  %841 = vmatprep.subr.bf16.mxu1 %v979_v44 }
  0x58   :  { %v95_v1 = vld [vmem:[#allocation3] sm:$0xff] }
  0x59   :  { %200 = vmatmul.mubr.f32.vlgmr.msra.gmra.mrb[0].mxu0 %v95_v1  ;;  %208 = vst [vmem:[#allocation3] sm:$0x1] %v207_v2  ;;  %212 = vst [vmem:[#allocation3 + $0x1] sm:$0x1] %v211_v3  ;;  %v221_v12 = vld [vmem:[#allocation2] sm:$0x1] }
  0x5a   :  { %812 = vmatpush3.bf16.msra.mxu0 %v1057_v7  ;;  %216 = vst [vmem:[#allocation3 + $0x2] sm:$0x1] %v215_v4  ;;  %v227_v7 = vld [vmem:[#allocation2] sm:$0x1]  ;;  %220 = vst [vmem:[#allocation3 + $0x3] sm:$0x1] %v219_v5 }
  0x5b   :  { %814 = vmatprep.subr.bf16.mxu0 %v1059_v8  ;;  %224 = vst [vmem:[#allocation3 + $0x4] sm:$0x1] %v223_v6  ;;  %228 = vst [vmem:[#allocation3 + $0x5] sm:$0x1] %v227_v7  ;;  %v231_v8 = vld [vmem:[#allocation2] sm:$0x1] }
  0x5c   :  { %232 = vst [vmem:[#allocation3 + $0x6] sm:$0x1] %v231_v8  ;;  %236 = vst [vmem:[#allocation3 + $0x7] sm:$0x1] %v235_v9  ;;  %v233_v15 = vld [vmem:[#allocation2] sm:$0x1] }
  0x5d   :  { %222 = vst [vmem:[#allocation3 + $0xb] sm:$0x1] %v221_v12  ;;  %234 = vst [vmem:[#allocation3 + $0xe] sm:$0x1] %v233_v15  ;;  %v237_v16 = vld [vmem:[#allocation2] sm:$0x1] }
  0x5e   :  { %816 = vmatpush3.bf16.msra.mxu0 %v1064_v13  ;;  %v225_v13 = vld [vmem:[#allocation2] sm:$0x1]  ;;  %238 = vst [vmem:[#allocation3 + $0xf] sm:$0x1] %v237_v16  ;;  %v493_v1 = vld [vmem:[#allocation9 + $0x50] sm:$0xff]  ;;  %v494_v2 = vld [vmem:[#allocation9 + $0x58] sm:$0xff] }
  0x5f   :  { %818 = vmatprep.subr.bf16.mxu0 %v1068_v14  ;;  %v229_v14 = vld [vmem:[#allocation2] sm:$0x1]  ;;  %226 = vst [vmem:[#allocation3 + $0xc] sm:$0x1] %v225_v13  ;;  %v857_v3 = vpack.c.bf16 %v494_v2, %v493_v1  ;;  %v495_v4 = vld [vmem:[#allocation9 + $0x60] sm:$0xff]  ;;  %v497_v7 = vld [vmem:[#allocation9 + $0x70] sm:$0xff] }
  0x60   :  { %230 = vst [vmem:[#allocation3 + $0xd] sm:$0x1] %v229_v14  ;;  %v349_v18 = vld [vmem:[#allocation2] sm:$0x1]  ;;  %v498_v8 = vld [vmem:[#allocation9 + $0x78] sm:$0xff] }
  0x61   :  { %v361_v21 = vld [vmem:[#allocation2] sm:$0x1]  ;;  %v863_v9 = vpack.c.bf16 %v498_v8, %v497_v7 }
  0x62   :  { %820 = vmatpush3.bf16.msra.mxu0 %v1072_v19  ;;  %v353_v19 = vld [vmem:[#allocation2] sm:$0x1] }
  0x63   :  { %822 = vmatprep.subr.bf16.mxu0 %v1076_v20  ;;  %v239_v17 = vld [vmem:[#allocation3] sm:$0xff] }
  0x64   :  { %350 = vst [vmem:[#allocation3 + $0x1] sm:$0x1] %v349_v18  ;;  %v357_v20 = vld [vmem:[#allocation2] sm:$0x1]  ;;  %354 = vst [vmem:[#allocation3 + $0x2] sm:$0x1] %v353_v19 }
  0x65   :  { %358 = vst [vmem:[#allocation3 + $0x3] sm:$0x1] %v357_v20  ;;  %362 = vst [vmem:[#allocation3 + $0x4] sm:$0x1] %v361_v21  ;;  %v365_v22 = vld [vmem:[#allocation2] sm:$0x1] }
  0x66   :  { %824 = vmatpush3.bf16.msra.mxu0 %v1080_v26  ;;  %v369_v23 = vld [vmem:[#allocation2] sm:$0x1]  ;;  %366 = vst [vmem:[#allocation3 + $0x5] sm:$0x1] %v365_v22 }
  0x67   :  { %826 = vmatprep.subr.bf16.mxu0 %v1084_v27  ;;  %v373_v24 = vld [vmem:[#allocation2] sm:$0x1]  ;;  %370 = vst [vmem:[#allocation3 + $0x6] sm:$0x1] %v369_v23 }
  0x68   :  { %374 = vst [vmem:[#allocation3 + $0x7] sm:$0x1] %v373_v24  ;;  %v1113_v26 = vld [vmem:[%s1135_s2] ss:$0 sm:$0xff] }
  0x69   :  { %v355_v35 = vld [vmem:[#allocation2] sm:$0x1] }
  0x6a   :  { %828 = vmatpush3.bf16.msra.mxu0 %v1088_v32  ;;  %v359_v36 = vld [vmem:[#allocation2] sm:$0x1] }
  0x6b   :  { %830 = vmatprep.subr.bf16.mxu0 %v1092_v34  ;;  %v351_v34 = vld [vmem:[#allocation2] sm:$0x1] }
  0x6c   :  { %v363_v37 = vld [vmem:[#allocation2] sm:$0x1] }
  0x6d   :  { %v367_v38 = vld [vmem:[#allocation2] sm:$0x1] }
  0x6e   :  { %832 = vmatpush3.bf16.msra.mxu0 %v767_v46  ;;  %v371_v39 = vld [vmem:[#allocation2] sm:$0x1]  ;;  %v486_v46 = vld [vmem:[#allocation9 + $0x18] sm:$0xff] }
  0x6f   :  { %834 = vmatprep.subr.bf16.mxu0 %v769_v52  ;;  %v375_v40 = vld [vmem:[#allocation2] sm:$0x1]  ;;  %v845_v47 = vpack.c.bf16 %v486_v46, %v485_v43  ;;  %v490_v52 = vld [vmem:[#allocation9 + $0x38] sm:$0xff] }
  0x70   :  { %v488_v49 = vld [vmem:[#allocation9 + $0x28] sm:$0xff]  ;;  %v851_v53 = vpack.c.bf16 %v490_v52, %v489_v51 }
  0x71   :  { %v848_v50 = vpack.c.bf16 %v488_v49, %v487_v48  ;;  %v496_v5 = vld [vmem:[#allocation9 + $0x68] sm:$0xff] }
  0x72   :  { %836 = vmatpush3.bf16.msra.mxu0 %v771_v59  ;;  %v860_v6 = vpack.c.bf16 %v496_v5, %v495_v4  ;;  %v499_v16 = vld [vmem:[%s1137_s4] sm:$0x1] }
  0x73   :  { %838 = vmatprep.subr.bf16.mxu0 %v773_v60 }
  0x76   :  { %840 = vmatpush3.bf16.msra.mxu0 %v775_v63  ;;  %v492_v63 = vld [vmem:[#allocation9 + $0x48] sm:$0xff] }
  0x77   :  { %v854_v0 = vpack.c.bf16 %v492_v63, %v491_v62 }
 0x12c   :  { %v620_v25 = vpop.f32.mrb[0].mxu0 }
 0x12d   :  { %v621_v27 = vpop.f32.mrb[1].mxu0 }
 0x12e   :  { %v622_v28 = vadd.f32 %v621_v27, %v620_v25 }
 0x130   :  { %v202_v29 = vadd.f32 %v622_v28, %v1113_v26 }
 0x132   :  { %874 = vtanh.f32 %v202_v29 }
 0x13c   :  { %v875_v30 = vpop.eup %874 }
 0x13d   :  { %206 = vst [vmem:[#allocation2 + $0x8] sm:$0xff] %v875_v30 }
 0x144   :  { %v209_v31 = vld [vmem:[#allocation2 + $0x9] sm:$0x1]  ;;  %v345_v32 = vld [vmem:[#allocation2 + $0x8] sm:$0x1] }
 0x145   :  { %210 = vst [vmem:[#allocation3 + $0x8] sm:$0x1] %v209_v31  ;;  %346 = vst [vmem:[#allocation3] sm:$0x1] %v345_v32 }
 0x14c   :  { %v240_v33 = vld [vmem:[#allocation3 + $0x8] sm:$0xff]  ;;  %v377_v61 = vld [vmem:[#allocation3] sm:$0xff] }
 0x14d   :  { %337 = vmatprep.mubr.f32.mxu1 %v240_v33  ;;  %352 = vst [vmem:[#allocation3 + $0x9] sm:$0x1] %v351_v34  ;;  %356 = vst [vmem:[#allocation3 + $0xa] sm:$0x1] %v355_v35 }
 0x14e   :  { %338 = vmatmul.mubr.f32.vlgmr.msra.gmra.mrb[0].mxu1 %v239_v17  ;;  %360 = vst [vmem:[#allocation3 + $0xb] sm:$0x1] %v359_v36  ;;  %364 = vst [vmem:[#allocation3 + $0xc] sm:$0x1] %v363_v37 }
 0x14f   :  { %368 = vst [vmem:[#allocation3 + $0xd] sm:$0x1] %v367_v38  ;;  %372 = vst [vmem:[#allocation3 + $0xe] sm:$0x1] %v371_v39  ;;  %843 = vmatpush3.bf16.msra.mxu1 %v842_v45  ;;  %742 = vmatprep.mubr.msk.f32.mxu1 %vm980_vm0, %v981_v10 }
 0x150   :  { %376 = vst [vmem:[#allocation3 + $0xf] sm:$0x1] %v375_v40  ;;  %844 = vmatprep.subr.bf16.mxu1 %v979_v44 }
 0x153   :  { %846 = vmatpush3.bf16.msra.mxu1 %v845_v47 }
 0x154   :  { %847 = vmatprep.subr.bf16.mxu1 %v979_v44 }
 0x157   :  { %849 = vmatpush3.bf16.msra.mxu1 %v848_v50 }
 0x158   :  { %850 = vmatprep.subr.bf16.mxu1 %v979_v44 }
 0x15b   :  { %852 = vmatpush3.bf16.msra.mxu1 %v851_v53 }
 0x15c   :  { %853 = vmatprep.subr.bf16.mxu1 %v979_v44 }
 0x15f   :  { %855 = vmatpush3.bf16.msra.mxu1 %v854_v0 }
 0x160   :  { %856 = vmatprep.subr.bf16.mxu1 %v979_v44 }
 0x163   :  { %858 = vmatpush3.bf16.msra.mxu1 %v857_v3 }
 0x164   :  { %859 = vmatprep.subr.bf16.mxu1 %v979_v44 }
 0x167   :  { %861 = vmatpush3.bf16.msra.mxu1 %v860_v6 }
 0x168   :  { %862 = vmatprep.subr.bf16.mxu1 %v979_v44 }
 0x16b   :  { %864 = vmatpush3.bf16.msra.mxu1 %v863_v9 }
 0x221   :  { %v655_v54 = vpop.f32.mrb[0].mxu1 }
 0x222   :  { %v656_v55 = vpop.f32.mrb[1].mxu1 }
 0x223   :  { %v657_v56 = vadd.f32 %v656_v55, %v655_v54 }
 0x225   :  { %v340_v57 = vadd.f32 %v657_v56, %v1113_v26 }
 0x227   :  { %876 = vtanh.f32 %v340_v57 }
 0x231   :  { %v877_v58 = vpop.eup %876 }
 0x232   :  { %344 = vst [vmem:[#allocation2 + $0x10] sm:$0xff] %v877_v58 }
 0x239   :  { %v347_v59 = vld [vmem:[#allocation2 + $0x10] sm:$0x1] }
 0x23a   :  { %348 = vst [vmem:[#allocation3 + $0x8] sm:$0x1] %v347_v59 }
 0x241   :  { %v378_v60 = vld [vmem:[#allocation3 + $0x8] sm:$0xff] }
 0x242   :  { %475 = vmatprep.mubr.f32.mxu0 %v378_v60 }
 0x243   :  { %476 = vmatmul.mubr.f32.vlgmr.msra.gmra.mrb[2].mxu0 %v377_v61 }
 0x316   :  { %v690_v11 = vpop.f32.mrb[2].mxu0 }
 0x317   :  { %v691_v12 = vpop.f32.mrb[3].mxu0 }
 0x318   :  { %v692_v13 = vadd.f32 %v691_v12, %v690_v11 }
 0x31a   :  { %v478_v14 = vadd.f32 %v692_v13, %v1113_v26 }
 0x31c   :  { %878 = vtanh.f32 %v478_v14 }
 0x326   :  { %v879_v15 = vpop.eup %878 }
 0x327   :  { %743 = vmatmul.mubr.f32.vlgmr.msra.gmra.mrb[2].mxu1 %v879_v15 }
 0x3fa   :  { %v566_v17 = vpop.f32.mrb[2].mxu1 }
 0x3fb   :  { %v567_v18 = vadd.f32 %v566_v17, %v499_v16  ;;  %v744_v19 = vpop.f32.mrb[3].mxu1 }
 0x3fd   :  { %570 = vst [vmem:[#allocation10] sm:$0x1] %v567_v18 }
 0x3fe   :  { %957 = shalt.err (!%p954_p0)
}
 0x3ff   :  { %s958_s12 = scalar_lea.hbm %s1138_s5, 16 }
 0x400   :  { %p959_p1 = scmp.ne.s32.totalorder %s1138_s5, %s958_s12  ;;  %p962_p2 = scmp.lt.u32.totalorder %s958_s12, %s1138_s5 }
 0x402   :  { %p964_p3 = pnand %p962_p2, %p959_p1 }
 0x404   :  { %967 = shalt.err (!%p964_p3)
}
 0x405   :  { %580 = dma.vmem_to_hbm [thread:$0]  %s578_s7, 16, %s1138_s5, [#allocation6]  }
 0x406   :  { %972 = dma.done.wait [#allocation6], 16  }
 0x407   :  { %973 = vsyncadd [#allocation6], 4294967280 }
 0x408   :  { %584 = vsyncpa [#allocation5], 1 }
 0x409   :  { %585 = vsyncpa [#allocation8], 1 }
 0x40a   :  { %586 = vsyncpa [#allocation6], 1 }

</bundles_post_ra>
